<compile_context>
chip_gen: v6e
topology: v6e:2x2x1
jax: 0.10.0
libtpu: 0.0.40
codegen_flags: <defaults>
</compile_context>

<pallas_src>
import jax
import jax.numpy as jnp
from jax import lax
from jax.experimental import pallas as pl
from jax.experimental.pallas import tpu as pltpu


# ----------------------------------------------------------------------------- kernel
def mlp_kernel(x_ref,                      # (TM, D)   batch tile, original batch-major layout
               w1_ref, b1_ref,             # (H, D) bf16, (H, 1) f32
               w2_ref, b2_ref,             # (H, H) bf16 (bn1 folded), (H, 1) f32
               w3_ref, b3_ref,             # (H, H) bf16, (H, 1) f32
               w4_ref, b4_ref,             # (H, 1) f32 (bn2 folded), (1, 1) f32
               o_ref):                     # (1, TM)   lane-dense output row
    # bf16 operands for the MXU; accumulation stays f32 via preferred_element_type.
    x = x_ref[...].astype(jnp.bfloat16)

    # lin1 + ReLU (dropout == identity in eval).  Contract the shared D axis directly
    # (no host-side transpose of x); result is feature-major (H, TM).
    h = lax.dot_general(w1_ref[...], x, (((1,), (1,)), ((), ())),
                        preferred_element_type=jnp.float32)
    h = jnp.maximum(h + b1_ref[...], 0.0)

    # lin2 (with bn1 folded in) + ReLU (dropout == identity).
    h = jnp.dot(w2_ref[...], h.astype(jnp.bfloat16), preferred_element_type=jnp.float32)
    h = jnp.maximum(h + b2_ref[...], 0.0)

    # lin3 + ReLU (bn2 folded into lin4's weights).
    h = jnp.dot(w3_ref[...], h.astype(jnp.bfloat16), preferred_element_type=jnp.float32)
    h = jnp.maximum(h + b3_ref[...], 0.0)

    # lin4 (hidden -> 1) as a VPU/XLU sublane reduction; lane-dense (1, TM) output row.
    o_ref[...] = jnp.sum(h * w4_ref[...], axis=0, keepdims=True) + b4_ref[...]


# ---------------------------------------------------------------------------- wrapper
def _pick_tm(n):
    """Largest multiple-of-128 divisor of n (capped at 2048) that keeps >= 4 grid steps
    (>= 2 per v7x TensorCore); otherwise the largest such divisor; otherwise the full batch."""
    for cand in (2048, 1024, 512, 256, 128):
        if n % cand == 0 and n // cand >= 4:
            return cand
    for cand in (2048, 1024, 512, 256, 128):
        if n % cand == 0:
            return cand
    return n


def _vmem_limit_bytes():
    """~48 MiB on v7x (64 MiB physical VMEM), ~112 MiB on v5e/v6e (128 MiB physical)."""
    mib = 1024 * 1024
    try:
        cap = pltpu.get_tpu_info().vmem_capacity_bytes
    except Exception:
        cap = 64 * mib          # conservative (v7x-sized) fallback
    return int(max(min(cap - 16 * mib, 112 * mib), 32 * mib))


def mlp_forward(x, kparams, *, tm=None):
    """x: (N, D) float32 (or bfloat16). kparams: folded params from fold_params(). Returns (N, 1) f32."""
    N, D = x.shape
    H = kparams["w1"].shape[0]
    assert kparams["w1"].shape[1] == D

    if tm is None:
        tm = _pick_tm(N)
    assert N % tm == 0, "batch size must be divisible by tm (pad the batch on the host)"
    assert tm == N or tm % 128 == 0, "tm must be a multiple of 128 (lane axis) or the full batch"

    full = lambda shape: pl.BlockSpec(shape, lambda i: (0,) * len(shape))

    out = pl.pallas_call(
        mlp_kernel,
        out_shape=jax.ShapeDtypeStruct((1, N), jnp.float32),
        grid_spec=pltpu.PrefetchScalarGridSpec(
            num_scalar_prefetch=0,
            grid=(N // tm,),
            in_specs=[
                pl.BlockSpec((tm, D), lambda i: (i, 0)),        # x tile (batch-major, no host x.T)
                full((H, D)), full((H, 1)),                     # lin1
                full((H, H)), full((H, 1)),                     # lin2 (+ folded bn1)
                full((H, H)), full((H, 1)),                     # lin3
                full((H, 1)), full((1, 1)),                     # lin4 (+ folded bn2)
            ],
            out_specs=pl.BlockSpec((1, tm), lambda i: (0, i)),  # lane-dense output row
        ),
        compiler_params=pltpu.CompilerParams(
            dimension_semantics=("parallel",),                  # shard batch tiles over TCs
            vmem_limit_bytes=_vmem_limit_bytes(),               # generation-aware VMEM cap
        ),
    )(x,
      kparams["w1"], kparams["b1"],
      kparams["w2"], kparams["b2"],
      kparams["w3"], kparams["b3"],
      kparams["w4"], kparams["b4"])

    return out.reshape(N, 1)


# --------------------------------------------------------------- host-side param prep
def make_torch_params(key, input_size, hidden_dim):
    """PyTorch-layout params: Linear W is (out, in), b is (out,); BN is (gamma, beta, mean, var)."""
    ks = jax.random.split(key, 16)

    def lin(kw, kb, fan_out, fan_in):
        bound = 1.0 / jnp.sqrt(jnp.float32(fan_in))
        w = jax.random.uniform(kw, (fan_out, fan_in), jnp.float32, -bound, bound)
        b = jax.random.uniform(kb, (fan_out,), jnp.float32, -bound, bound)
        return w, b

    W1, b1 = lin(ks[0], ks[1], hidden_dim, input_size)
    W2, b2 = lin(ks[2], ks[3], hidden_dim, hidden_dim)
    W3, b3 = lin(ks[4], ks[5], hidden_dim, hidden_dim)
    W4, b4 = lin(ks[6], ks[7], 1, hidden_dim)

    def bn(kg, kb, km, kv):
        gamma = 1.0 + 0.1 * jax.random.normal(kg, (hidden_dim,), jnp.float32)
        beta = 0.1 * jax.random.normal(kb, (hidden_dim,), jnp.float32)
        mean = 0.1 * jax.random.normal(km, (hidden_dim,), jnp.float32)
        var = 0.5 + jax.random.uniform(kv, (hidden_dim,), jnp.float32)
        return gamma, beta, mean, var

    return dict(W1=W1, b1=b1, W2=W2, b2=b2, W3=W3, b3=b3, W4=W4, b4=b4,
                bn1=bn(ks[8], ks[9], ks[10], ks[11]),
                bn2=bn(ks[12], ks[13], ks[14], ks[15]))


def fold_params(p, eps=1e-5):
    """Fold eval-mode BN affines into the following Linear layers; emit bf16 MXU weights,
    f32 biases / lin4 reduction weights, all feature-major."""
    g1, be1, m1, v1 = p["bn1"]
    g2, be2, m2, v2 = p["bn2"]
    s1 = g1 / jnp.sqrt(v1 + eps)
    t1 = be1 - m1 * s1
    s2 = g2 / jnp.sqrt(v2 + eps)
    t2 = be2 - m2 * s2

    # bn1 -> lin2:  W2 @ (s1*h + t1) + b2 == (W2 * s1) @ h + (W2 @ t1 + b2)
    w2 = p["W2"] * s1[None, :]
    b2 = p["b2"] + p["W2"] @ t1
    # bn2 -> lin4:  W4 @ (s2*h + t2) + b4 == (W4 * s2) @ h + (W4 @ t2 + b4)
    w4 = (p["W4"][0] * s2)[:, None]                       # (H, 1) column for the VPU reduction
    b4 = (p["b4"] + p["W4"][0] @ t2).reshape(1, 1)

    bf16 = jnp.bfloat16
    return dict(
        w1=p["W1"].astype(bf16), b1=p["b1"][:, None],
        w2=w2.astype(bf16),      b2=b2[:, None],
        w3=p["W3"].astype(bf16), b3=p["b3"][:, None],
        w4=w4,                   b4=b4,
    )


# --------------------------------------------------------------------------- reference
def mlp_reference(x, p, eps=1e-5):
    """Pure-JAX f32 mirror of the PyTorch eval forward (unfolded BN, batch-major)."""
    g1, be1, m1, v1 = p["bn1"]
    g2, be2, m2, v2 = p["bn2"]
    h1 = jnp.maximum(x @ p["W1"].T + p["b1"], 0.0)
    h1 = (h1 - m1) / jnp.sqrt(v1 + eps) * g1 + be1
    h2 = jnp.maximum(h1 @ p["W2"].T + p["b2"], 0.0)
    h3 = jnp.maximum(h2 @ p["W3"].T + p["b3"], 0.0)
    h3 = (h3 - m2) / jnp.sqrt(v2 + eps) * g2 + be2
    return h3 @ p["W4"].T + p["b4"]


# -------------------------------------------------------------------------------- main
if __name__ == "__main__":
    key = jax.random.PRNGKey(0)
    kx, kp = jax.random.split(key)

    N, D, H = 512, 16, 32          # batch=512, input_size=16, hidden_dim=32
    x = jax.random.normal(kx, (N, D), jnp.float32)

    torch_params = make_torch_params(kp, D, H)
    kparams = fold_params(torch_params)

    # Default tm picker -> tm=128, a 4-step "parallel" grid (>= 2 steps per v7x TensorCore,
    # warms up the per-core pipeline); for production N it picks lane-dense tiles up to 2048.
    out = mlp_forward(x, kparams)
    out = jax.block_until_ready(out)

    ref = mlp_reference(x, torch_params)
    assert out.shape == (N, 1)
    # bf16 MXU operands -> compare against the f32 reference with a bf16-appropriate tolerance.
    assert jnp.allclose(out, ref, atol=5e-2, rtol=5e-2), "mismatch vs. JAX reference"

    print("KERNEL_OK")
</pallas_src>

<mosaic_0001>
module attributes {stable_mosaic.version = 11 : i64} {
  func.func @mlp_kernel(%arg0: i32, %arg1: memref<128x16xf32, #tpu.memory_space<vmem>>, %arg2: memref<32x16xbf16, #tpu.memory_space<vmem>>, %arg3: memref<32x1xf32, #tpu.memory_space<vmem>>, %arg4: memref<32x32xbf16, #tpu.memory_space<vmem>>, %arg5: memref<32x1xf32, #tpu.memory_space<vmem>>, %arg6: memref<32x32xbf16, #tpu.memory_space<vmem>>, %arg7: memref<32x1xf32, #tpu.memory_space<vmem>>, %arg8: memref<32x1xf32, #tpu.memory_space<vmem>>, %arg9: memref<1x1xf32, #tpu.memory_space<vmem>>, %arg10: memref<1x128xf32, #tpu.memory_space<vmem>>) attributes {dimension_semantics = [#tpu.dimension_semantics<parallel>], iteration_bounds = array<i64: 4>, scalar_prefetch = 0 : i64, scratch_operands = 0 : i64, tpu.core_type = #tpu.core_type<tc>, window_params = [{transform_indices = @transform_0, window_bounds = array<i64: 128, 16>}, {pipeline_mode = #tpu.pipeline_mode<synchronous>, transform_indices = @transform_1, window_bounds = array<i64: 32, 16>}, {pipeline_mode = #tpu.pipeline_mode<synchronous>, transform_indices = @transform_2, window_bounds = array<i64: 32, 1>}, {pipeline_mode = #tpu.pipeline_mode<synchronous>, transform_indices = @transform_3, window_bounds = array<i64: 32, 32>}, {pipeline_mode = #tpu.pipeline_mode<synchronous>, transform_indices = @transform_4, window_bounds = array<i64: 32, 1>}, {pipeline_mode = #tpu.pipeline_mode<synchronous>, transform_indices = @transform_5, window_bounds = array<i64: 32, 32>}, {pipeline_mode = #tpu.pipeline_mode<synchronous>, transform_indices = @transform_6, window_bounds = array<i64: 32, 1>}, {pipeline_mode = #tpu.pipeline_mode<synchronous>, transform_indices = @transform_7, window_bounds = array<i64: 32, 1>}, {pipeline_mode = #tpu.pipeline_mode<synchronous>, transform_indices = @transform_8, window_bounds = array<i64: 1, 1>}, {transform_indices = @transform_9, window_bounds = array<i64: 1, 128>}]} {
    %c0 = arith.constant 0 : index
    %c0_0 = arith.constant 0 : index
    %0 = vector.load %arg1[%c0, %c0_0] : memref<128x16xf32, #tpu.memory_space<vmem>>, vector<128x16xf32>
    %1 = arith.truncf %0 : vector<128x16xf32> to vector<128x16xbf16>
    %c0_1 = arith.constant 0 : index
    %c0_2 = arith.constant 0 : index
    %2 = vector.load %arg2[%c0_1, %c0_2] : memref<32x16xbf16, #tpu.memory_space<vmem>>, vector<32x16xbf16>
    %cst = arith.constant dense<0.000000e+00> : vector<32x128xf32>
    %3 = tpu.matmul %2, %1, %cst {dimension_numbers = #tpu.dot_dimension_numbers<[1], [1], [0], [0], [0, 0, 1, 0], [], []>} : vector<32x16xbf16>, vector<128x16xbf16>, vector<32x128xf32> -> vector<32x128xf32>
    %c0_3 = arith.constant 0 : index
    %c0_4 = arith.constant 0 : index
    %4 = vector.load %arg3[%c0_3, %c0_4] : memref<32x1xf32, #tpu.memory_space<vmem>>, vector<32x1xf32>
    %5 = vector.broadcast %4 : vector<32x1xf32> to vector<32x128xf32>
    %6 = arith.addf %3, %5 : vector<32x128xf32>
    %cst_5 = arith.constant 0.000000e+00 : f32
    %7 = vector.broadcast %cst_5 : f32 to vector<32x128xf32>
    %8 = arith.maximumf %6, %7 : vector<32x128xf32>
    %c0_6 = arith.constant 0 : index
    %c0_7 = arith.constant 0 : index
    %9 = vector.load %arg4[%c0_6, %c0_7] : memref<32x32xbf16, #tpu.memory_space<vmem>>, vector<32x32xbf16>
    %10 = arith.truncf %8 : vector<32x128xf32> to vector<32x128xbf16>
    %cst_8 = arith.constant dense<0.000000e+00> : vector<32x128xf32>
    %11 = tpu.matmul %9, %10, %cst_8 {dimension_numbers = #tpu.dot_dimension_numbers<[1], [0], [0], [1], [0, 0, 1, 1], [], []>} : vector<32x32xbf16>, vector<32x128xbf16>, vector<32x128xf32> -> vector<32x128xf32>
    %c0_9 = arith.constant 0 : index
    %c0_10 = arith.constant 0 : index
    %12 = vector.load %arg5[%c0_9, %c0_10] : memref<32x1xf32, #tpu.memory_space<vmem>>, vector<32x1xf32>
    %13 = vector.broadcast %12 : vector<32x1xf32> to vector<32x128xf32>
    %14 = arith.addf %11, %13 : vector<32x128xf32>
    %cst_11 = arith.constant 0.000000e+00 : f32
    %15 = vector.broadcast %cst_11 : f32 to vector<32x128xf32>
    %16 = arith.maximumf %14, %15 : vector<32x128xf32>
    %c0_12 = arith.constant 0 : index
    %c0_13 = arith.constant 0 : index
    %17 = vector.load %arg6[%c0_12, %c0_13] : memref<32x32xbf16, #tpu.memory_space<vmem>>, vector<32x32xbf16>
    %18 = arith.truncf %16 : vector<32x128xf32> to vector<32x128xbf16>
    %cst_14 = arith.constant dense<0.000000e+00> : vector<32x128xf32>
    %19 = tpu.matmul %17, %18, %cst_14 {dimension_numbers = #tpu.dot_dimension_numbers<[1], [0], [0], [1], [0, 0, 1, 1], [], []>} : vector<32x32xbf16>, vector<32x128xbf16>, vector<32x128xf32> -> vector<32x128xf32>
    %c0_15 = arith.constant 0 : index
    %c0_16 = arith.constant 0 : index
    %20 = vector.load %arg7[%c0_15, %c0_16] : memref<32x1xf32, #tpu.memory_space<vmem>>, vector<32x1xf32>
    %21 = vector.broadcast %20 : vector<32x1xf32> to vector<32x128xf32>
    %22 = arith.addf %19, %21 : vector<32x128xf32>
    %cst_17 = arith.constant 0.000000e+00 : f32
    %23 = vector.broadcast %cst_17 : f32 to vector<32x128xf32>
    %24 = arith.maximumf %22, %23 : vector<32x128xf32>
    %c0_18 = arith.constant 0 : index
    %c0_19 = arith.constant 0 : index
    %25 = vector.load %arg8[%c0_18, %c0_19] : memref<32x1xf32, #tpu.memory_space<vmem>>, vector<32x1xf32>
    %26 = vector.broadcast %25 : vector<32x1xf32> to vector<32x128xf32>
    %27 = arith.mulf %24, %26 : vector<32x128xf32>
    %cst_20 = arith.constant dense<0.000000e+00> : vector<128xf32>
    %28 = vector.multi_reduction <add>, %27, %cst_20 [0] : vector<32x128xf32> to vector<128xf32>
    %29 = vector.shape_cast %28 : vector<128xf32> to vector<1x128xf32>
    %c0_21 = arith.constant 0 : index
    %c0_22 = arith.constant 0 : index
    %30 = vector.load %arg9[%c0_21, %c0_22] : memref<1x1xf32, #tpu.memory_space<vmem>>, vector<1x1xf32>
    %31 = vector.broadcast %30 : vector<1x1xf32> to vector<1x128xf32>
    %32 = arith.addf %29, %31 : vector<1x128xf32>
    %c0_23 = arith.constant 0 : index
    %c0_24 = arith.constant 0 : index
    %33 = vector.load %arg10[%c0_23, %c0_24] : memref<1x128xf32, #tpu.memory_space<vmem>>, vector<1x128xf32>
    tpu.vector_store %arg10[%c0_23, %c0_24], %32 {strides = array<i32>} : memref<1x128xf32, #tpu.memory_space<vmem>>, vector<1x128xf32>,
    return
  }
  func.func @transform_0(%arg0: i32) -> (i32, i32) {
    %c0_i32 = arith.constant 0 : i32
    %c0_i32_0 = arith.constant 0 : i32
    return %arg0, %c0_i32 : i32, i32
  }
  func.func @transform_1(%arg0: i32) -> (i32, i32) {
    %c0_i32 = arith.constant 0 : i32
    %c0_i32_0 = arith.constant 0 : i32
    %c0_i32_1 = arith.constant 0 : i32
    return %c0_i32, %c0_i32_0 : i32, i32
  }
  func.func @transform_2(%arg0: i32) -> (i32, i32) {
    %c0_i32 = arith.constant 0 : i32
    %c0_i32_0 = arith.constant 0 : i32
    %c0_i32_1 = arith.constant 0 : i32
    return %c0_i32, %c0_i32_0 : i32, i32
  }
  func.func @transform_3(%arg0: i32) -> (i32, i32) {
    %c0_i32 = arith.constant 0 : i32
    %c0_i32_0 = arith.constant 0 : i32
    %c0_i32_1 = arith.constant 0 : i32
    return %c0_i32, %c0_i32_0 : i32, i32
  }
  func.func @transform_4(%arg0: i32) -> (i32, i32) {
    %c0_i32 = arith.constant 0 : i32
    %c0_i32_0 = arith.constant 0 : i32
    %c0_i32_1 = arith.constant 0 : i32
    return %c0_i32, %c0_i32_0 : i32, i32
  }
  func.func @transform_5(%arg0: i32) -> (i32, i32) {
    %c0_i32 = arith.constant 0 : i32
    %c0_i32_0 = arith.constant 0 : i32
    %c0_i32_1 = arith.constant 0 : i32
    return %c0_i32, %c0_i32_0 : i32, i32
  }
  func.func @transform_6(%arg0: i32) -> (i32, i32) {
    %c0_i32 = arith.constant 0 : i32
    %c0_i32_0 = arith.constant 0 : i32
    %c0_i32_1 = arith.constant 0 : i32
    return %c0_i32, %c0_i32_0 : i32, i32
  }
  func.func @transform_7(%arg0: i32) -> (i32, i32) {
    %c0_i32 = arith.constant 0 : i32
    %c0_i32_0 = arith.constant 0 : i32
    %c0_i32_1 = arith.constant 0 : i32
    return %c0_i32, %c0_i32_0 : i32, i32
  }
  func.func @transform_8(%arg0: i32) -> (i32, i32) {
    %c0_i32 = arith.constant 0 : i32
    %c0_i32_0 = arith.constant 0 : i32
    %c0_i32_1 = arith.constant 0 : i32
    return %c0_i32, %c0_i32_0 : i32, i32
  }
  func.func @transform_9(%arg0: i32) -> (i32, i32) {
    %c0_i32 = arith.constant 0 : i32
    %c0_i32_0 = arith.constant 0 : i32
    return %c0_i32, %arg0 : i32, i32
  }
}

</mosaic_0001>

<bundles_post_ra>
// kernel: tpu_custom_call.1
= control target key start
LH: loop header
LB: loop body
LE: loop exit
PB: predicated region body
PF: predicated region fallthrough
CT: control target
= control target key end

     0   :  { %s1237_s0 = inlined_call_operand.vmem [shape: f32[512,16], index: 0, kind: input, shape index: {}]   ;;  %s1238_s1 = inlined_call_operand.vmem [shape: bf16[32,16], index: 1, kind: input, shape index: {}]   ;;  %s1239_s2 = inlined_call_operand.vmem [shape: f32[32,1], index: 2, kind: input, shape index: {}]   ;;  %s1240_s3 = inlined_call_operand.vmem [shape: bf16[32,32], index: 3, kind: input, shape index: {}]   ;;  %s1241_s4 = inlined_call_operand.vmem [shape: f32[32,1], index: 4, kind: input, shape index: {}]   ;;  %s1242_s5 = inlined_call_operand.vmem [shape: bf16[32,32], index: 5, kind: input, shape index: {}]   ;;  %s1243_s6 = inlined_call_operand.vmem [shape: f32[32,1], index: 6, kind: input, shape index: {}]   ;;  %s1244_s7 = inlined_call_operand.vmem [shape: f32[32,1], index: 7, kind: input, shape index: {}]   ;;  %s1245_s8 = inlined_call_operand.<no memory space> [shape: f32[1,1], index: 8, kind: input, shape index: {}]   ;;  %s1246_s9 = inlined_call_operand.hbm [shape: f32[1,512], index: 9, kind: output, shape index: {}]  }
   0x1   :  { %v14_v0 = vstv %s1245_s8 }
   0x2   :  { %15 = vst [vmem:[#allocation2] sm:$0x1] %v14_v0 }
   0x3   :  { %16 = vsyncpa [#allocation4], 0 }
   0x4   :  { %18 = vsyncpa [#allocation4 + $0x1], 0  ;;  %s1045_s11 = smov 0   ;;  %s1047_s12 = smov 0  }
   0x5   :  { %s1049_s13 = smov 0   ;;  %s1051_s14 = smov 0  }
   0x6 LB: > { %s796_s8 = sadd.s32 4294967295, %s988_s14   ;;  %s797_s15 = sadd.s32 4294967294, %s988_s14   ;;  %s988_s14 = sphi %s1051_s14, %s1252_s14   ;;  %s984_s13 = sphi %s1049_s13, %s1251_s13   ;;  %s980_s12 = sphi %s1047_s12, %s1250_s12   ;;  %s976_s11 = sphi %s1045_s11, %s1249_s11  }
   0x7   : > { %s1068_s16 = sadd.s32 1, %s988_s14   ;;  %s225_s17 = sadd.s32 1, %s984_s13 }
   0x8   : > { %s222_s18 = ssub.s32 %s988_s14, %s1068_s16  ;;  %p235_p0 = scmp.ne.s32.totalorder %s984_s13, %s980_s12 }
   0x9   : > { %p223_p1 = scmp.eq.s32.totalorder %s222_s18, 0  ;;  %p236_p2 = scmp.eq.s32.totalorder %s796_s8, 3 }
   0xa   : > { %p241_p3 = scmp.ne.s32.totalorder %s980_s12, %s976_s11  ;;  %p242_p4 = scmp.eq.s32.totalorder %s797_s15, 3 }
   0xb   : > { %s1078_s19 = scalar_select %p223_p1, %s984_s13, %s225_s17  }
   0xc   : > { %p1080_p5 = por %p236_p2, %p235_p0  ;;  %p1084_p6 = por %p242_p4, %p241_p3 }
   0xd   : > { %p800_p7 = scmp.ge.s32.totalorder %s988_s14, 1  ;;  %p293_p8 = scmp.lt.s32.totalorder %s988_s14, 5 }
   0xf   : > { %p294_p9 = pnand %p800_p7, %p293_p8 }
  0x10   : > { %s1090_s22 = sshll.u32 (!%p294_p9), %s796_s8, 4  ;;  %s326_s17 = sand.u32 (!%p294_p9), 1, %s980_s12  }
  0x11   : > { %297 = sbr.rel (%p294_p9) target bundleno = 753 (0x2f1), region = 56  ;;  %p329_p10 = scmp.lt.s32.totalorder (!%p294_p9), %s1090_s22, 63 }
  0x12   : > { %s327_s23 = scalar_lea.vmem (!%p294_p9), [#allocation3], %s326_s17  ;;  %s730_s28 = scalar_lea.sflag (!%p294_p9), [#allocation4], %s326_s17 }
  0x13   : > { %s742_s24 = sshll.u32 (!%p294_p9), %s327_s23, 4  ;;  %s991_s29 = smov (!%p294_p9), [#allocation3]   ;;  %s743_s24 = int_to_ptr.vmem [resolvable:$true] %s742_s24 }
  0x16   : > { %v922_v1 = vld [vmem:[%s1238_s1] sm:$0xff]   ;;  %vm397_vm0 = vcmask 130048   ;;  %v365_v2 = vld [vmem:[%s1239_s2 + $0x10] sm:$0xff]  ;;  %s330_s27 = scalar_select %p329_p10, %s1090_s22, 63  ;;  %v990_v3 = vmov 0   ;;  %v366_v5 = vld [vmem:[%s1239_s2 + $0x18] sm:$0xff] }
  0x17   : > { %852 = vmatprep.mubr.msk.bf16.mxu0 %vm397_vm0, %v922_v1  ;;  %920 = vset.pattern.permute.xlu0 %v990_v3  ;;  %v363_v4 = vld [vmem:[%s1239_s2] sm:$0xff]  ;;  %v364_v6 = vld [vmem:[%s1239_s2 + $0x8] sm:$0xff]  ;;  %v489_v13 = vld [vmem:[%s1241_s4 + $0x10] sm:$0xff]  ;;  %vm521_vm1 = vcmask 261120  }
  0x18   : > { %379 = vperm.xlu0 %920, %v365_v2   ;;  %921 = vset.pattern.permute.xlu1 %v990_v3  ;;  %s802_s30 = sshll.u32 %s330_s27, 3  ;;  %v490_v15 = vld [vmem:[%s1241_s4 + $0x18] sm:$0xff]  ;;  %v487_v16 = vld [vmem:[%s1241_s4] sm:$0xff]  ;;  %v488_v19 = vld [vmem:[%s1241_s4 + $0x8] sm:$0xff]  ;;  %s740_s27 = scalar_lea.hbm %s1246_s9, %s1090_s22 }
  0x19   : > { %369 = vperm.xlu1 %921, %v363_v4   ;;  %s1110_s18 = scalar_lea.vmem %s1237_s0, %s802_s30  ;;  %v587_v22 = vld [vmem:[%s1243_s6] sm:$0xff]  ;;  %v588_v23 = vld [vmem:[%s1243_s6 + $0x8] sm:$0xff]  ;;  %v589_v26 = vld [vmem:[%s1243_s6 + $0x10] sm:$0xff]  ;;  %s932_s30 = sshll.u32 %s991_s29, 4  ;;  %s933_s30 = int_to_ptr.vmem [resolvable:$false] %s932_s30 }
  0x1a   : > { %v349_v7 = vld [vmem:[%s1110_s18 + $0x70] sm:$0xff]  ;;  %v350_v8 = vld [vmem:[%s1110_s18 + $0x78] sm:$0xff]  ;;  %v347_v9 = vld [vmem:[%s1110_s18 + $0x60] sm:$0xff]  ;;  %s934_s10 = scalar_lea.vmem %s933_s30, 32  ;;  %p935_p0 = scmp.lt.s32.totalorder %s743_s24, %s933_s30 }
  0x1b   : > { %v358_v10 = vpack.c.bf16 %v350_v8, %v349_v7  ;;  %v348_v11 = vld [vmem:[%s1110_s18 + $0x68] sm:$0xff]  ;;  %v345_v17 = vld [vmem:[%s1110_s18 + $0x50] sm:$0xff]  ;;  %v346_v18 = vld [vmem:[%s1110_s18 + $0x58] sm:$0xff] }
  0x1c   : > { %384 = vperm.xlu0 %920, %v366_v5   ;;  %v357_v12 = vpack.c.bf16 %v348_v11, %v347_v9  ;;  %v356_v21 = vpack.c.bf16 %v346_v18, %v345_v17  ;;  %v343_v24 = vld [vmem:[%s1110_s18 + $0x40] sm:$0xff]  ;;  %v344_v25 = vld [vmem:[%s1110_s18 + $0x48] sm:$0xff]  ;;  %v590_v27 = vld [vmem:[%s1243_s6 + $0x18] sm:$0xff] }
  0x1d   : > { %374 = vperm.xlu1 %921, %v364_v6   ;;  %872 = vmatprep.subr.msk.bf16.mxu0 %vm397_vm0, %v358_v10  ;;  %v426_v14 = vsel %vm397_vm0, %v358_v10, 0  ;;  %v355_v29 = vpack.c.bf16 %v344_v25, %v343_v24  ;;  %v680_v30 = vld [vmem:[%s1244_s7] sm:$0xff]  ;;  %v681_v31 = vld [vmem:[%s1244_s7 + $0x8] sm:$0xff]  ;;  %v341_v32 = vld [vmem:[%s1110_s18 + $0x30] sm:$0xff] }
  0x1e   : > { %837 = vmatpush3.bf16.xpose.msra.mxu0 %v426_v14  ;;  %v423_v20 = vsel %vm397_vm0, %v357_v12, 0  ;;  %v420_v28 = vsel %vm397_vm0, %v356_v21, 0  ;;  %v342_v33 = vld [vmem:[%s1110_s18 + $0x38] sm:$0xff]  ;;  %v682_v34 = vld [vmem:[%s1244_s7 + $0x10] sm:$0xff]  ;;  %v717_v38 = vld [vmem:[#allocation2] sm:$0x1] }
  0x1f   : > { %873 = vmatprep.subr.msk.bf16.mxu0 %vm397_vm0, %v357_v12  ;;  %v683_v35 = vld [vmem:[%s1244_s7 + $0x18] sm:$0xff]  ;;  %v417_v36 = vsel %vm397_vm0, %v355_v29, 0  ;;  %v354_v37 = vpack.c.bf16 %v342_v33, %v341_v32  ;;  %v339_v39 = vld [vmem:[%s1110_s18 + $0x20] sm:$0xff]  ;;  %v340_v40 = vld [vmem:[%s1110_s18 + $0x28] sm:$0xff] }
  0x20   : > { %503 = vperm.xlu0 %920, %v489_v13   ;;  %v353_v42 = vpack.c.bf16 %v340_v40, %v339_v39  ;;  %v337_v43 = vld [vmem:[%s1110_s18 + $0x10] sm:$0xff]  ;;  %v338_v44 = vld [vmem:[%s1110_s18 + $0x18] sm:$0xff]  ;;  %v335_v47 = vld [vmem:[%s1110_s18] sm:$0xff] }
  0x21   : > { %508 = vperm.xlu1 %921, %v490_v15   ;;  %v414_v41 = vsel %vm397_vm0, %v354_v37, 0  ;;  %v352_v46 = vpack.c.bf16 %v338_v44, %v337_v43  ;;  %v336_v48 = vld [vmem:[%s1110_s18 + $0x8] sm:$0xff]  ;;  %v924_v53 = vld [vmem:[%s1240_s3] sm:$0xff]   ;;  %s928_s18 = scalar_lea.vmem %s743_s24, 16 }
  0x22   : > { %v411_v45 = vsel %vm397_vm0, %v353_v42, 0  ;;  %v351_v50 = vpack.c.bf16 %v336_v48, %v335_v47  ;;  %v923_v52 = vld [vmem:[%s1238_s1 + $0x8] sm:$0xff]   ;;  %860 = vmatprep.mubr.msk.bf16.mxu1 %vm521_vm1, %v924_v53  ;;  %v926_v9 = vld [vmem:[%s1242_s5] sm:$0xff]   ;;  %p929_p11 = scmp.ne.s32.totalorder %s743_s24, %s928_s18  ;;  %p936_p1 = scmp.lt.s32.totalorder %s934_s10, %s928_s18 }
  0x23   : > { %v408_v49 = vsel %vm397_vm0, %v352_v46, 0  ;;  %v925_v8 = vld [vmem:[%s1240_s3 + $0x8] sm:$0xff]  }
  0x24   : > { %493 = vperm.xlu0 %920, %v487_v16   ;;  %v405_v51 = vsel %vm397_vm0, %v351_v50, 0  ;;  %p930_p12 = pnand %p929_p11, %p1080_p5  ;;  %p937_p2 = por %p936_p1, %p935_p0 }
  0x25   : > { %498 = vperm.xlu1 %921, %v488_v19  }
  0x26   : > { %839 = vmatpush3.bf16.xpose.msra.mxu0 %v423_v20  ;;  %p931_p13 = pneg %p930_p12 }
  0x27   : > { %874 = vmatprep.subr.msk.bf16.mxu0 %vm397_vm0, %v356_v21 }
  0x28   : > { %593 = vperm.xlu0 %920, %v587_v22   ;;  %p938_p3 = pnand %p937_p2, %p931_p13 }
  0x29   : > { %598 = vperm.xlu1 %921, %v588_v23  }
  0x2c   : > { %603 = vperm.xlu0 %920, %v589_v26  }
  0x2d   : > { %608 = vperm.xlu1 %921, %v590_v27  }
  0x2e   : > { %841 = vmatpush3.bf16.xpose.msra.mxu0 %v420_v28  ;;  %v927_v28 = vld [vmem:[%s1242_s5 + $0x8] sm:$0xff]  }
  0x2f   : > { %875 = vmatprep.subr.msk.bf16.mxu0 %vm397_vm0, %v355_v29 }
  0x30   : > { %686 = vperm.xlu0 %920, %v680_v30  }
  0x31   : > { %691 = vperm.xlu1 %921, %v681_v31  }
  0x34   : > { %696 = vperm.xlu0 %920, %v682_v34  }
  0x35   : > { %701 = vperm.xlu1 %921, %v683_v35  }
  0x36   : > { %843 = vmatpush3.bf16.xpose.msra.mxu0 %v417_v36 }
  0x37   : > { %876 = vmatprep.subr.msk.bf16.mxu0 %vm397_vm0, %v354_v37 }
  0x38   : > { %720 = vperm.xlu0 %920, %v717_v38  }
  0x3e   : > { %845 = vmatpush3.bf16.xpose.msra.mxu0 %v414_v41 }
  0x3f   : > { %877 = vmatprep.subr.msk.bf16.mxu0 %vm397_vm0, %v353_v42 }
  0x46   : > { %847 = vmatpush3.bf16.xpose.msra.mxu0 %v411_v45 }
  0x47   : > { %878 = vmatprep.subr.msk.bf16.mxu0 %vm397_vm0, %v352_v46 }
  0x4e   : > { %849 = vmatpush3.bf16.xpose.msra.mxu0 %v408_v49 }
  0x4f   : > { %879 = vmatprep.subr.msk.bf16.mxu0 %vm397_vm0, %v351_v50 }
  0x56   : > { %851 = vmatpush3.bf16.xpose.msra.mxu0 %v405_v51 }
  0x5d   : > { %853 = vmatmul.mubr.msk.bf16.vlgmr.msra.gmra.mxu0 %vm397_vm0, %v923_v52 }
  0x93   : > { %v380_v54 = vpop.permute.xlu0 %379 }
  0x94   : > { %v370_v55 = vpop.permute.xlu1 %369 }
  0x97   : > { %v385_v59 = vpop.permute.xlu0 %384 }
  0x98   : > { %v375_v63 = vpop.permute.xlu1 %374 }
  0x9b   : > { %v504_v10 = vpop.permute.xlu0 %503 }
  0x9c   : > { %v509_v11 = vpop.permute.xlu1 %508 }
  0x9f   : > { %v494_v15 = vpop.permute.xlu0 %493 }
  0xa0   : > { %v499_v19 = vpop.permute.xlu1 %498 }
  0xa3   : > { %v594_v29 = vpop.permute.xlu0 %593 }
  0xa4   : > { %v599_v30 = vpop.permute.xlu1 %598 }
  0xa7   : > { %v604_v31 = vpop.permute.xlu0 %603 }
  0xa8   : > { %v609_v33 = vpop.permute.xlu1 %608 }
  0xab   : > { %v687_v38 = vpop.permute.xlu0 %686 }
  0xac   : > { %v692_v43 = vpop.permute.xlu1 %691 }
  0xaf   : > { %v697_v49 = vpop.permute.xlu0 %696 }
  0xb0   : > { %v702_v52 = vpop.permute.xlu1 %701 }
 0x11d   : > { %v854_v56 = vpop.f32.mrf.mxu0 }
 0x11e   : > { %v471_v58 = vadd.f32 %v854_v56, %v380_v54 }
 0x11f   : > { %v462_v57 = vpop.f32.mrf.mxu0 }
 0x120   : > { %v463_v61 = vadd.f32 %v462_v57, %v370_v55  ;;  %v479_v1 = vmax.f32 %v471_v58, 0.0  ;;  %v723_v55 = vlaneseq }
 0x121   : > { %v855_v60 = vpop.f32.mrf.mxu0 }
 0x122   : > { %v474_v62 = vadd.f32 %v855_v60, %v385_v59  ;;  %v477_v4 = vmax.f32 %v463_v61, 0.0  ;;  %v724_v58 = vshrl.u32 %v723_v55, 7 }
 0x123   : > { %v465_v0 = vpop.f32.mrf.mxu0 }
 0x124   : > { %v480_v2 = vmax.f32 %v474_v62, 0.0  ;;  %v466_v3 = vadd.f32 %v465_v0, %v375_v63  ;;  %v725_v61 = vsub.s32 0, %v724_v58  ;;  %v721_v63 = vpop.permute.xlu0 %720 }
 0x126   : > { %v478_v5 = vmax.f32 %v466_v3, 0.0  ;;  %v486_v6 = vpack.c.bf16 %v480_v2, %v479_v1  ;;  %v726_v1 = vrot.slane %v721_v63, %v725_v61 }
 0x128   : > { %v485_v7 = vpack.c.bf16 %v478_v5, %v477_v4  ;;  %856 = vmatprep.subr.bf16.mxu1 %v486_v6 }
 0x129   : > { %857 = vmatpush3.bf16.msra.mxu1 %v486_v6 }
 0x12a   : > { %858 = vmatprep.subr.bf16.mxu1 %v485_v7 }
 0x12d   : > { %859 = vmatpush3.bf16.msra.mxu1 %v485_v7 }
 0x130   : > { %861 = vmatmul.mubr.msk.bf16.vlgmr.msra.gmra.mxu1 %vm521_vm1, %v925_v8 }
 0x131   : > { %868 = vmatprep.mubr.msk.bf16.mxu1 %vm521_vm1, %v926_v9 }
 0x1f0   : > { %v862_v12 = vpop.f32.mrf.mxu1 }
 0x1f1   : > { %v571_v14 = vadd.f32 %v862_v12, %v504_v10 }
 0x1f2   : > { %v562_v13 = vpop.f32.mrf.mxu1 }
 0x1f3   : > { %v563_v17 = vadd.f32 %v562_v13, %v494_v15  ;;  %v579_v21 = vmax.f32 %v571_v14, 0.0 }
 0x1f4   : > { %v863_v16 = vpop.f32.mrf.mxu1 }
 0x1f5   : > { %v574_v18 = vadd.f32 %v863_v16, %v509_v11  ;;  %v577_v24 = vmax.f32 %v563_v17, 0.0 }
 0x1f6   : > { %v565_v20 = vpop.f32.mrf.mxu1 }
 0x1f7   : > { %v580_v22 = vmax.f32 %v574_v18, 0.0  ;;  %v566_v23 = vadd.f32 %v565_v20, %v499_v19 }
 0x1f9   : > { %v586_v25 = vpack.c.bf16 %v580_v22, %v579_v21  ;;  %v578_v26 = vmax.f32 %v566_v23, 0.0 }
 0x1fb   : > { %v585_v27 = vpack.c.bf16 %v578_v26, %v577_v24  ;;  %864 = vmatprep.subr.bf16.mxu1 %v586_v25 }
 0x1fc   : > { %865 = vmatpush3.bf16.msra.mxu1 %v586_v25 }
 0x1fd   : > { %866 = vmatprep.subr.bf16.mxu1 %v585_v27 }
 0x200   : > { %867 = vmatpush3.bf16.msra.mxu1 %v585_v27 }
 0x203   : > { %869 = vmatmul.mubr.msk.bf16.vlgmr.msra.gmra.mxu1 %vm521_vm1, %v927_v28 }
 0x2c3   : > { %v870_v32 = vpop.f32.mrf.mxu1 }
 0x2c4   : > { %v670_v37 = vadd.f32 %v870_v32, %v604_v31 }
 0x2c5   : > { %v661_v34 = vpop.f32.mrf.mxu1 }
 0x2c6   : > { %v662_v35 = vadd.f32 %v661_v34, %v594_v29  ;;  %v678_v44 = vmax.f32 %v670_v37, 0.0 }
 0x2c7   : > { %v871_v36 = vpop.f32.mrf.mxu1 }
 0x2c8   : > { %v676_v40 = vmax.f32 %v662_v35, 0.0  ;;  %v673_v41 = vadd.f32 %v871_v36, %v609_v33  ;;  %v706_v50 = vmul.f32 %v697_v49, %v678_v44 }
 0x2c9   : > { %v664_v39 = vpop.f32.mrf.mxu1 }
 0x2ca   : > { %v665_v42 = vadd.f32 %v664_v39, %v599_v30  ;;  %v704_v46 = vmul.f32 %v687_v38, %v676_v40  ;;  %v679_v47 = vmax.f32 %v673_v41, 0.0 }
 0x2cc   : > { %v677_v45 = vmax.f32 %v665_v42, 0.0  ;;  %v707_v53 = vmul.f32 %v702_v52, %v679_v47 }
 0x2ce   : > { %v705_v48 = vmul.f32 %v692_v43, %v677_v45 }
 0x2d0   : > { %v708_v51 = vadd.f32 %v705_v48, %v704_v46 }
 0x2d2   : > { %v709_v54 = vadd.f32 %v708_v51, %v706_v50 }
 0x2d4   : > { %v710_v56 = vadd.f32 %v709_v54, %v707_v53 }
 0x2d6   : > { %v711_v57 = vrot.slane %v710_v56, 4 }
 0x2d8   : > { %v712_v59 = vadd.f32 %v711_v57, %v710_v56 }
 0x2da   : > { %v713_v60 = vrot.slane %v712_v59, 2 }
 0x2dc   : > { %v714_v62 = vadd.f32 %v713_v60, %v712_v59 }
 0x2de   : > { %v715_v0 = vrot.slane %v714_v62, 1 }
 0x2e0   : > { %v716_v2 = vadd.f32 %v715_v0, %v714_v62 }
 0x2e2   : > { %v727_v3 = vadd.f32 %v726_v1, %v716_v2 }
 0x2e4   : > { %728 = vst [vmem:[%s327_s23] sm:$0x1] %v727_v3 }
 0x2e5   : > { %941 = shalt.err (!%p938_p3)
}
 0x2e6   : > { %s942_s8 = scalar_lea.hbm %s740_s27, 16  ;;  %s946_s17 = scalar_lea.hbm %s1246_s9, 64 }
 0x2e7   : > { %p943_p4 = scmp.ne.s32.totalorder %s740_s27, %s942_s8  ;;  %p947_p9 = scmp.lt.s32.totalorder %s740_s27, %s1246_s9 }
 0x2e8   : > { %p948_p10 = scmp.lt.s32.totalorder %s946_s17, %s942_s8 }
 0x2e9   : > { %p944_p7 = pnand %p943_p4, %p1080_p5 }
 0x2ea   : > { %p949_p11 = por %p948_p10, %p947_p9 }
 0x2eb   : > { %p945_p8 = pneg %p944_p7 }
 0x2ed   : > { %p950_p12 = pnand %p949_p11, %p945_p8 }
 0x2ef   : > { %953 = shalt.err (!%p950_p12)
}
 0x2f0   : > { %880 = dma.vmem_to_hbm [thread:$0]  (%p1080_p5), %s743_s24, 16, %s740_s27, %s730_s28  }
 0x2f1 PF: > { %p886_p13 = scmp.ge.s32.totalorder %s988_s14, 2  ;;  %s754_s26 = sand.u32 1, %s976_s11  }
 0x2f2   : > { %s755_s18 = scalar_lea.sflag [#allocation4], %s754_s26 }
 0x2f3   : > { %p883_p0 = pnand %p886_p13, %p1084_p6 }
 0x2f5   : > { %p884_p1 = pneg %p883_p0 }
 0x2f7   : > { %971 = dma.done.wait (%p884_p1), %s755_s18, 16  }
 0x2f8   : > { %973 = vsyncadd (%p884_p1), %s755_s18, 4294967280  ;;  %p21_p2 = scmp.ge.s32.totalorder %s1068_s16, 6   ;;  %s1249_s11 = smov %s980_s12 }
 0x2f9   : > { %s1250_s12 = smov %s984_s13  ;;  %s1251_s13 = smov %s1078_s19 }
 0x2fa   : > { %s1252_s14 = smov %s1068_s16  ;;  %23 = sbr.rel (!%p21_p2) target bundleno = 6 (0x6), region = 91 }
 0x2ff   :  { %759 = vsyncpa [#allocation4], 1 }
 0x300   :  { %761 = vsyncpa [#allocation4 + $0x1], 1 }

</bundles_post_ra>
